<compile_context>
chip_gen: v7x
topology: tpu7x:2x2x1
jax: 0.10.0
libtpu: 0.0.40
codegen_flags: <defaults>
</compile_context>

<pallas_src>
import jax
import jax.numpy as jnp
from jax.experimental import pallas as pl
from jax.experimental.pallas import tpu as pltpu

IN_FEATURES = 784
OUT_FEATURES = 10
TB_MAX = 1024  # batch-tile rows; ~3.1 MiB/buffer of x, safe on all TPU generations


def _round_up(n, m):
    return ((n + m - 1) // m) * m


def softmaxnet_kernel(x_ref, w_ref, b_ref, o_ref):
    # Linear: logits = x @ W^T + b  (W^T materialized as w_ref: (784, 10)) -> MXU.
    logits = jnp.dot(
        x_ref[...], w_ref[...], preferred_element_type=jnp.float32
    ) + b_ref[...]
    # Numerically stable softmax over dim=1 (10 classes).
    m = jnp.max(logits, axis=1, keepdims=True)
    e = jnp.exp(logits - m)
    denom = jnp.sum(e, axis=1, keepdims=True)
    # Exact division (not approx EUP reciprocal): keeps row sums == 1 to f32
    # rounding, and this kernel is memory-bound so the divide is free.
    o_ref[...] = (e / denom).astype(o_ref.dtype)


def softmaxnet_forward(x, weight, bias, *, tb_max=TB_MAX):
    """x: (B, 1, 28, 28) or (B, 784) float32; weight: (10, 784); bias: (10,)."""
    B = x.shape[0]
    x2d = x.reshape(B, -1).astype(jnp.float32)             # glue: flatten (view)
    w_t = weight.T.astype(jnp.float32)                      # (784, 10)
    b2d = bias.reshape(1, OUT_FEATURES).astype(jnp.float32)

    # Batch tile: multiple of 8 sublanes, capped at tb_max rows.
    tb = min(tb_max, _round_up(B, 8))
    b_pad = _round_up(B, tb)
    if b_pad != B:
        x2d = jnp.pad(x2d, ((0, b_pad - B), (0, 0)))        # ragged last tile -> zero rows

    grid = (b_pad // tb,)
    out = pl.pallas_call(
        softmaxnet_kernel,
        out_shape=jax.ShapeDtypeStruct((b_pad, OUT_FEATURES), jnp.float32),
        grid_spec=pltpu.PrefetchScalarGridSpec(
            num_scalar_prefetch=0,
            grid=grid,
            in_specs=[
                # x streams tile-by-tile (double-buffered by Pallas).
                pl.BlockSpec((tb, IN_FEATURES), lambda i: (i, 0)),
                # Weight / bias stay resident across all batch tiles.
                pl.BlockSpec((IN_FEATURES, OUT_FEATURES), lambda i: (0, 0)),
                pl.BlockSpec((1, OUT_FEATURES), lambda i: (0, 0)),
            ],
            out_specs=pl.BlockSpec((tb, OUT_FEATURES), lambda i: (i, 0)),
        ),
        compiler_params=pltpu.CompilerParams(
            # Batch tiles are independent -> shard across TCs on v7x megacore.
            dimension_semantics=("parallel",),
        ),
    )(x2d, w_t, b2d)

    return out[:B] if b_pad != B else out


if __name__ == "__main__":
    key = jax.random.PRNGKey(0)
    kx, kw, kb = jax.random.split(key, 3)

    B = 2
    # Input consistent with Linear(784, 10): (B, 1, 28, 28) images.
    x = jax.random.normal(kx, (B, 1, 28, 28), dtype=jnp.float32)

    # Deterministic parameter init (PyTorch-style uniform(-1/sqrt(fan_in), +1/sqrt(fan_in))).
    bound = 1.0 / (IN_FEATURES ** 0.5)
    weight = jax.random.uniform(
        kw, (OUT_FEATURES, IN_FEATURES), minval=-bound, maxval=bound, dtype=jnp.float32
    )
    bias = jax.random.uniform(
        kb, (OUT_FEATURES,), minval=-bound, maxval=bound, dtype=jnp.float32
    )

    out = softmaxnet_forward(x, weight, bias)
    out = jax.block_until_ready(out)

    # Reference check in plain JAX.
    x2d = x.reshape(B, -1)
    ref = jax.nn.softmax(x2d @ weight.T + bias, axis=1)
    assert out.shape == (B, OUT_FEATURES)
    assert jnp.allclose(out, ref, atol=1e-4, rtol=1e-4)
    assert jnp.allclose(jnp.sum(out, axis=1), 1.0, atol=1e-4)

    print("KERNEL_OK")
</pallas_src>

<mosaic_0001>
module attributes {stable_mosaic.version = 11 : i64} {
  func.func @softmaxnet_kernel(%arg0: i32, %arg1: memref<8x784xf32, #tpu.memory_space<vmem>>, %arg2: memref<784x10xf32, #tpu.memory_space<vmem>>, %arg3: memref<1x10xf32, #tpu.memory_space<vmem>>, %arg4: memref<8x10xf32, #tpu.memory_space<vmem>>) attributes {dimension_semantics = [#tpu.dimension_semantics<parallel>], iteration_bounds = array<i64: 1>, scalar_prefetch = 0 : i64, scratch_operands = 0 : i64, tpu.core_type = #tpu.core_type<tc>, window_params = [{transform_indices = @transform_0, window_bounds = array<i64: 8, 784>}, {pipeline_mode = #tpu.pipeline_mode<synchronous>, transform_indices = @transform_1, window_bounds = array<i64: 784, 10>}, {pipeline_mode = #tpu.pipeline_mode<synchronous>, transform_indices = @transform_2, window_bounds = array<i64: 1, 10>}, {transform_indices = @transform_3, window_bounds = array<i64: 8, 10>}]} {
    %c0 = arith.constant 0 : index
    %c0_0 = arith.constant 0 : index
    %0 = vector.load %arg1[%c0, %c0_0] : memref<8x784xf32, #tpu.memory_space<vmem>>, vector<8x784xf32>
    %c0_1 = arith.constant 0 : index
    %c0_2 = arith.constant 0 : index
    %1 = vector.load %arg2[%c0_1, %c0_2] : memref<784x10xf32, #tpu.memory_space<vmem>>, vector<784x10xf32>
    %cst = arith.constant dense<0.000000e+00> : vector<8x10xf32>
    %2 = tpu.matmul %0, %1, %cst {dimension_numbers = #tpu.dot_dimension_numbers<[1], [0], [0], [1], [0, 0, 1, 1], [], []>} : vector<8x784xf32>, vector<784x10xf32>, vector<8x10xf32> -> vector<8x10xf32>
    %c0_3 = arith.constant 0 : index
    %c0_4 = arith.constant 0 : index
    %3 = vector.load %arg3[%c0_3, %c0_4] : memref<1x10xf32, #tpu.memory_space<vmem>>, vector<1x10xf32>
    %4 = vector.broadcast %3 : vector<1x10xf32> to vector<8x10xf32>
    %5 = arith.addf %2, %4 : vector<8x10xf32>
    %cst_5 = arith.constant dense<0xFF800000> : vector<8xf32>
    %6 = vector.multi_reduction <maximumf>, %5, %cst_5 [1] : vector<8x10xf32> to vector<8xf32>
    %7 = vector.shape_cast %6 : vector<8xf32> to vector<8x1xf32>
    %8 = vector.broadcast %7 : vector<8x1xf32> to vector<8x10xf32>
    %9 = arith.subf %5, %8 : vector<8x10xf32>
    %10 = math.exp %9 : vector<8x10xf32>
    %cst_6 = arith.constant dense<0.000000e+00> : vector<8xf32>
    %11 = vector.multi_reduction <add>, %10, %cst_6 [1] : vector<8x10xf32> to vector<8xf32>
    %12 = vector.shape_cast %11 : vector<8xf32> to vector<8x1xf32>
    %13 = vector.broadcast %12 : vector<8x1xf32> to vector<8x10xf32>
    %14 = arith.divf %10, %13 : vector<8x10xf32>
    %c0_7 = arith.constant 0 : index
    %c0_8 = arith.constant 0 : index
    %15 = vector.load %arg4[%c0_7, %c0_8] : memref<8x10xf32, #tpu.memory_space<vmem>>, vector<8x10xf32>
    tpu.vector_store %arg4[%c0_7, %c0_8], %14 {strides = array<i32>} : memref<8x10xf32, #tpu.memory_space<vmem>>, vector<8x10xf32>,
    return
  }
  func.func @transform_0(%arg0: i32) -> (i32, i32) {
    %c0_i32 = arith.constant 0 : i32
    %c0_i32_0 = arith.constant 0 : i32
    return %arg0, %c0_i32 : i32, i32
  }
  func.func @transform_1(%arg0: i32) -> (i32, i32) {
    %c0_i32 = arith.constant 0 : i32
    %c0_i32_0 = arith.constant 0 : i32
    %c0_i32_1 = arith.constant 0 : i32
    return %c0_i32, %c0_i32_0 : i32, i32
  }
  func.func @transform_2(%arg0: i32) -> (i32, i32) {
    %c0_i32 = arith.constant 0 : i32
    %c0_i32_0 = arith.constant 0 : i32
    %c0_i32_1 = arith.constant 0 : i32
    return %c0_i32, %c0_i32_0 : i32, i32
  }
  func.func @transform_3(%arg0: i32) -> (i32, i32) {
    %c0_i32 = arith.constant 0 : i32
    %c0_i32_0 = arith.constant 0 : i32
    return %arg0, %c0_i32 : i32, i32
  }
}

</mosaic_0001>

<bundles_post_ra>
// kernel: tpu_custom_call.1
= control target key start
LH: loop header
LB: loop body
LE: loop exit
PB: predicated region body
PF: predicated region fallthrough
CT: control target
= control target key end

     0   :  { %s1043_s0 = inlined_call_operand.vmem [shape: f32[8,784], index: 0, kind: input, shape index: {}]   ;;  %s1044_s1 = inlined_call_operand.vmem [shape: f32[784,10], index: 1, kind: input, shape index: {}]   ;;  %s1045_s2 = inlined_call_operand.vmem [shape: f32[1,10], index: 2, kind: input, shape index: {}]   ;;  %s1046_s3 = inlined_call_operand.hbm [shape: f32[8,10], index: 3, kind: output, shape index: {}]  }
   0x1   :  { %v38_v0 = vld [vmem:[%s1044_s1 + $0x80] sm:$0xff]  ;;  %v39_v1 = vld [vmem:[%s1044_s1 + $0x88] sm:$0xff]  ;;  %v40_v11 = vld [vmem:[%s1044_s1 + $0x90] sm:$0xff] }
   0x2   :  { %v22_v2 = vld [vmem:[%s1044_s1] sm:$0xff]  ;;  %v555_v3 = vpack.c.bf16 %v39_v1, %v38_v0  ;;  %v23_v4 = vld [vmem:[%s1044_s1 + $0x8] sm:$0xff]  ;;  %v41_v13 = vld [vmem:[%s1044_s1 + $0x98] sm:$0xff] }
   0x3   :  { %v70_v5 = vld [vmem:[%s1044_s1 + $0x180] sm:$0xff]  ;;  %v71_v6 = vld [vmem:[%s1044_s1 + $0x188] sm:$0xff]  ;;  %v557_v7 = vpack.c.bf16 %v23_v4, %v22_v2  ;;  %v24_v14 = vld [vmem:[%s1044_s1 + $0x10] sm:$0xff]  ;;  %v559_v16 = vpack.c.bf16 %v41_v13, %v40_v11 }
   0x4   :  { %v587_v8 = vpack.c.bf16 %v71_v6, %v70_v5  ;;  %v54_v9 = vld [vmem:[%s1044_s1 + $0x100] sm:$0xff]  ;;  %v55_v10 = vld [vmem:[%s1044_s1 + $0x108] sm:$0xff]  ;;  %556 = vmatprep.subr.bf16.mxu0 %v555_v3  ;;  %v25_v15 = vld [vmem:[%s1044_s1 + $0x18] sm:$0xff] }
   0x5   :  { %v589_v12 = vpack.c.bf16 %v55_v10, %v54_v9  ;;  %558 = vmatpush3.bf16.msra.mxu0 %v557_v7  ;;  %v561_v17 = vpack.c.bf16 %v25_v15, %v24_v14  ;;  %v72_v18 = vld [vmem:[%s1044_s1 + $0x190] sm:$0xff]  ;;  %v73_v19 = vld [vmem:[%s1044_s1 + $0x198] sm:$0xff]  ;;  %v42_v23 = vld [vmem:[%s1044_s1 + $0xa0] sm:$0xff] }
   0x6   :  { %588 = vmatprep.subr.bf16.mxu1 %v587_v8  ;;  %v56_v20 = vld [vmem:[%s1044_s1 + $0x110] sm:$0xff]  ;;  %v591_v21 = vpack.c.bf16 %v73_v19, %v72_v18  ;;  %v57_v22 = vld [vmem:[%s1044_s1 + $0x118] sm:$0xff]  ;;  %v43_v24 = vld [vmem:[%s1044_s1 + $0xa8] sm:$0xff]  ;;  %560 = vmatprep.subr.bf16.mxu0 %v559_v16 }
   0x7   :  { %590 = vmatpush3.bf16.msra.mxu1 %v589_v12  ;;  %v593_v25 = vpack.c.bf16 %v57_v22, %v56_v20  ;;  %v563_v26 = vpack.c.bf16 %v43_v24, %v42_v23  ;;  %v26_v27 = vld [vmem:[%s1044_s1 + $0x20] sm:$0xff]  ;;  %v27_v28 = vld [vmem:[%s1044_s1 + $0x28] sm:$0xff]  ;;  %v44_v35 = vld [vmem:[%s1044_s1 + $0xb0] sm:$0xff] }
   0x8   :  { %v74_v29 = vld [vmem:[%s1044_s1 + $0x1a0] sm:$0xff]  ;;  %592 = vmatprep.subr.bf16.mxu1 %v591_v21  ;;  %v75_v30 = vld [vmem:[%s1044_s1 + $0x1a8] sm:$0xff]  ;;  %v565_v33 = vpack.c.bf16 %v27_v28, %v26_v27  ;;  %v45_v36 = vld [vmem:[%s1044_s1 + $0xb8] sm:$0xff] }
   0x9   :  { %v58_v31 = vld [vmem:[%s1044_s1 + $0x120] sm:$0xff]  ;;  %v59_v32 = vld [vmem:[%s1044_s1 + $0x128] sm:$0xff]  ;;  %562 = vmatpush3.bf16.msra.mxu0 %v561_v17  ;;  %v595_v34 = vpack.c.bf16 %v75_v30, %v74_v29  ;;  %v28_v37 = vld [vmem:[%s1044_s1 + $0x30] sm:$0xff]  ;;  %v567_v39 = vpack.c.bf16 %v45_v36, %v44_v35 }
   0xa   :  { %564 = vmatprep.subr.bf16.mxu0 %v563_v26  ;;  %v597_v38 = vpack.c.bf16 %v59_v32, %v58_v31  ;;  %v29_v40 = vld [vmem:[%s1044_s1 + $0x38] sm:$0xff]  ;;  %v76_v41 = vld [vmem:[%s1044_s1 + $0x1b0] sm:$0xff]  ;;  %v46_v46 = vld [vmem:[%s1044_s1 + $0xc0] sm:$0xff] }
   0xb   :  { %594 = vmatpush3.bf16.msra.mxu1 %v593_v25  ;;  %v77_v42 = vld [vmem:[%s1044_s1 + $0x1b8] sm:$0xff]  ;;  %v60_v44 = vld [vmem:[%s1044_s1 + $0x130] sm:$0xff]  ;;  %v47_v47 = vld [vmem:[%s1044_s1 + $0xc8] sm:$0xff]  ;;  %v569_v48 = vpack.c.bf16 %v29_v40, %v28_v37 }
   0xc   :  { %596 = vmatprep.subr.bf16.mxu1 %v595_v34  ;;  %v599_v43 = vpack.c.bf16 %v77_v42, %v76_v41  ;;  %v61_v45 = vld [vmem:[%s1044_s1 + $0x138] sm:$0xff]  ;;  %v78_v49 = vld [vmem:[%s1044_s1 + $0x1c0] sm:$0xff]  ;;  %v79_v50 = vld [vmem:[%s1044_s1 + $0x1c8] sm:$0xff]  ;;  %v571_v52 = vpack.c.bf16 %v47_v47, %v46_v46 }
   0xd   :  { %566 = vmatpush3.bf16.msra.mxu0 %v565_v33  ;;  %v601_v51 = vpack.c.bf16 %v61_v45, %v60_v44  ;;  %v30_v53 = vld [vmem:[%s1044_s1 + $0x40] sm:$0xff]  ;;  %v31_v54 = vld [vmem:[%s1044_s1 + $0x48] sm:$0xff]  ;;  %v603_v56 = vpack.c.bf16 %v79_v50, %v78_v49  ;;  %v48_v58 = vld [vmem:[%s1044_s1 + $0xd0] sm:$0xff]  ;;  %v686_v50 = vmov 0.0|0.0  }
   0xe   :  { %568 = vmatprep.subr.bf16.mxu0 %v567_v39  ;;  %v62_v55 = vld [vmem:[%s1044_s1 + $0x140] sm:$0xff]  ;;  %v63_v57 = vld [vmem:[%s1044_s1 + $0x148] sm:$0xff]  ;;  %v49_v59 = vld [vmem:[%s1044_s1 + $0xd8] sm:$0xff]  ;;  %v573_v62 = vpack.c.bf16 %v31_v54, %v30_v53 }
   0xf   :  { %598 = vmatpush3.bf16.msra.mxu1 %v597_v38  ;;  %v80_v60 = vld [vmem:[%s1044_s1 + $0x1d0] sm:$0xff]  ;;  %v81_v61 = vld [vmem:[%s1044_s1 + $0x1d8] sm:$0xff]  ;;  %v605_v63 = vpack.c.bf16 %v63_v57, %v62_v55  ;;  %v575_v0 = vpack.c.bf16 %v49_v59, %v48_v58  ;;  %v50_v6 = vld [vmem:[%s1044_s1 + $0xe0] sm:$0xff] }
  0x10   :  { %600 = vmatprep.subr.bf16.mxu1 %v599_v43  ;;  %v32_v1 = vld [vmem:[%s1044_s1 + $0x50] sm:$0xff]  ;;  %v33_v2 = vld [vmem:[%s1044_s1 + $0x58] sm:$0xff]  ;;  %v607_v4 = vpack.c.bf16 %v81_v61, %v80_v60  ;;  %v51_v7 = vld [vmem:[%s1044_s1 + $0xe8] sm:$0xff] }
  0x11   :  { %570 = vmatpush3.bf16.msra.mxu0 %v569_v48  ;;  %v64_v3 = vld [vmem:[%s1044_s1 + $0x150] sm:$0xff]  ;;  %v65_v5 = vld [vmem:[%s1044_s1 + $0x158] sm:$0xff]  ;;  %v82_v8 = vld [vmem:[%s1044_s1 + $0x1e0] sm:$0xff]  ;;  %v577_v10 = vpack.c.bf16 %v33_v2, %v32_v1  ;;  %v579_v14 = vpack.c.bf16 %v51_v7, %v50_v6 }
  0x12   :  { %572 = vmatprep.subr.bf16.mxu0 %v571_v52  ;;  %v83_v9 = vld [vmem:[%s1044_s1 + $0x1e8] sm:$0xff]  ;;  %v34_v11 = vld [vmem:[%s1044_s1 + $0x60] sm:$0xff]  ;;  %v609_v13 = vpack.c.bf16 %v65_v5, %v64_v3  ;;  %v52_v19 = vld [vmem:[%s1044_s1 + $0xf0] sm:$0xff] }
  0x13   :  { %602 = vmatpush3.bf16.msra.mxu1 %v601_v51  ;;  %v16_v12 = vld [vmem:[%s1043_s0 + $0x8] sm:$0xff]  ;;  %v66_v16 = vld [vmem:[%s1044_s1 + $0x160] sm:$0xff]  ;;  %v611_v18 = vpack.c.bf16 %v83_v9, %v82_v8  ;;  %v53_v20 = vld [vmem:[%s1044_s1 + $0xf8] sm:$0xff] }
  0x14   :  { %604 = vmatprep.subr.bf16.mxu1 %v603_v56  ;;  %v35_v15 = vld [vmem:[%s1044_s1 + $0x68] sm:$0xff]  ;;  %195 = vmatprep.mubr.f32.mxu0 %v16_v12  ;;  %v18_v21 = vld [vmem:[%s1043_s0 + $0x18] sm:$0xff]  ;;  %v84_v22 = vld [vmem:[%s1044_s1 + $0x1f0] sm:$0xff]  ;;  %v583_v26 = vpack.c.bf16 %v53_v20, %v52_v19 }
  0x15   :  { %574 = vmatpush3.bf16.msra.mxu0 %v573_v62  ;;  %v67_v17 = vld [vmem:[%s1044_s1 + $0x168] sm:$0xff]  ;;  %v85_v23 = vld [vmem:[%s1044_s1 + $0x1f8] sm:$0xff]  ;;  %265 = vmatprep.mubr.f32.mxu1 %v18_v21  ;;  %v581_v24 = vpack.c.bf16 %v35_v15, %v34_v11  ;;  %v36_v27 = vld [vmem:[%s1044_s1 + $0x70] sm:$0xff] }
  0x16   :  { %576 = vmatprep.subr.bf16.mxu0 %v575_v0  ;;  %v613_v25 = vpack.c.bf16 %v67_v17, %v66_v16  ;;  %v37_v28 = vld [vmem:[%s1044_s1 + $0x78] sm:$0xff]  ;;  %v68_v29 = vld [vmem:[%s1044_s1 + $0x170] sm:$0xff]  ;;  %v615_v30 = vpack.c.bf16 %v85_v23, %v84_v22  ;;  %v102_v32 = vld [vmem:[%s1044_s1 + $0x280] sm:$0xff] }
  0x17   :  { %606 = vmatpush3.bf16.msra.mxu1 %v605_v63  ;;  %v69_v31 = vld [vmem:[%s1044_s1 + $0x178] sm:$0xff]  ;;  %v103_v33 = vld [vmem:[%s1044_s1 + $0x288] sm:$0xff]  ;;  %v585_v34 = vpack.c.bf16 %v37_v28, %v36_v27  ;;  %v86_v37 = vld [vmem:[%s1044_s1 + $0x200] sm:$0xff] }
  0x18   :  { %608 = vmatprep.subr.bf16.mxu1 %v607_v4  ;;  %v617_v35 = vpack.c.bf16 %v69_v31, %v68_v29  ;;  %v619_v36 = vpack.c.bf16 %v103_v33, %v102_v32  ;;  %v87_v38 = vld [vmem:[%s1044_s1 + $0x208] sm:$0xff]  ;;  %v104_v39 = vld [vmem:[%s1044_s1 + $0x290] sm:$0xff]  ;;  %v105_v40 = vld [vmem:[%s1044_s1 + $0x298] sm:$0xff] }
  0x19   :  { %578 = vmatpush3.bf16.msra.mxu0 %v577_v10  ;;  %v15_v41 = vld [vmem:[%s1043_s0] sm:$0xff]  ;;  %v621_v42 = vpack.c.bf16 %v87_v38, %v86_v37  ;;  %v17_v43 = vld [vmem:[%s1043_s0 + $0x10] sm:$0xff]  ;;  %v623_v45 = vpack.c.bf16 %v105_v40, %v104_v39  ;;  %v89_v46 = vld [vmem:[%s1044_s1 + $0x218] sm:$0xff] }
  0x1a   :  { %580 = vmatprep.subr.bf16.mxu0 %v579_v14  ;;  %v88_v44 = vld [vmem:[%s1044_s1 + $0x210] sm:$0xff]  ;;  %v106_v47 = vld [vmem:[%s1044_s1 + $0x2a0] sm:$0xff]  ;;  %v107_v48 = vld [vmem:[%s1044_s1 + $0x2a8] sm:$0xff] }
  0x1b   :  { %610 = vmatpush3.bf16.msra.mxu1 %v609_v13  ;;  %v20_v49 = vld [vmem:[%s1043_s0 + $0x28] sm:$0xff]  ;;  %v118_v51 = vld [vmem:[%s1044_s1 + $0x300] sm:$0xff] }
  0x1c   :  { %612 = vmatprep.subr.bf16.mxu1 %v611_v18  ;;  %v119_v52 = vld [vmem:[%s1044_s1 + $0x308] sm:$0xff] }
  0x1d   :  { %582 = vmatpush3.bf16.msra.mxu0 %v581_v24  ;;  %v652_v53 = vpack.c.bf16 %v119_v52, %v118_v51 }
  0x1e   :  { %584 = vmatprep.subr.bf16.mxu0 %v583_v26 }
  0x1f   :  { %614 = vmatpush3.bf16.msra.mxu1 %v613_v25 }
  0x20   :  { %616 = vmatprep.subr.bf16.mxu1 %v615_v30 }
  0x21   :  { %586 = vmatpush3.bf16.msra.mxu0 %v585_v34 }
  0x22   :  { %620 = vmatprep.subr.bf16.mxu0 %v619_v36 }
  0x23   :  { %618 = vmatpush3.bf16.msra.mxu1 %v617_v35 }
  0x24   :  { %651 = vmatprep.subr.bf16.mxu1 %v686_v50  ;;  %196 = vmatmul.mubr.f32.vlgmr.msra.gmra.mrb[0].mxu0 %v15_v41 }
  0x25   :  { %8 = vsyncpa [#allocation3], 0  ;;  %622 = vmatpush3.bf16.msra.mxu0 %v621_v42  ;;  %v625_v54 = vpack.c.bf16 %v89_v46, %v88_v44  ;;  %v627_v55 = vpack.c.bf16 %v107_v48, %v106_v47  ;;  %v90_v56 = vld [vmem:[%s1044_s1 + $0x220] sm:$0xff]  ;;  %v91_v57 = vld [vmem:[%s1044_s1 + $0x228] sm:$0xff]  ;;  %335 = vmatprep.mubr.f32.mxu0 %v20_v49  ;;  %vm687_vm0 = vmmov 0   ;;  %v688_v60 = vmov 0.0  }
  0x26   :  { %266 = vmatmul.mubr.f32.vlgmr.msra.gmra.mrb[0].mxu1 %v17_v43  ;;  %624 = vmatprep.subr.bf16.mxu0 %v623_v45  ;;  %v108_v58 = vld [vmem:[%s1044_s1 + $0x2b0] sm:$0xff]  ;;  %v109_v59 = vld [vmem:[%s1044_s1 + $0x2b8] sm:$0xff]  ;;  %vm127_vm1 = vcmask 130048   ;;  %v629_v62 = vpack.c.bf16 %v91_v57, %v90_v56  ;;  %v110_v2 = vld [vmem:[%s1044_s1 + $0x2c0] sm:$0xff]  ;;  %vm411_vm2 = vcmask 80896  }
  0x27   :  { %653 = vmatpush3.bf16.msra.mxu1 %v652_v53  ;;  %552 = vmatprep.mubr.msk.f32.mxu1 %vm687_vm0, %v688_v60  ;;  %v21_v61 = vld [vmem:[%s1043_s0 + $0x30] sm:$0xff]  ;;  %v631_v63 = vpack.c.bf16 %v109_v59, %v108_v58  ;;  %v93_v1 = vld [vmem:[%s1044_s1 + $0x238] sm:$0xff]  ;;  %v111_v3 = vld [vmem:[%s1044_s1 + $0x2c8] sm:$0xff] }
  0x28   :  { %v92_v0 = vld [vmem:[%s1044_s1 + $0x230] sm:$0xff]  ;;  %v635_v5 = vpack.c.bf16 %v111_v3, %v110_v2  ;;  %v94_v6 = vld [vmem:[%s1044_s1 + $0x240] sm:$0xff]  ;;  %v95_v7 = vld [vmem:[%s1044_s1 + $0x248] sm:$0xff] }
  0x29   :  { %626 = vmatpush3.bf16.msra.mxu0 %v625_v54  ;;  %v633_v4 = vpack.c.bf16 %v93_v1, %v92_v0  ;;  %v112_v8 = vld [vmem:[%s1044_s1 + $0x2d0] sm:$0xff]  ;;  %v113_v9 = vld [vmem:[%s1044_s1 + $0x2d8] sm:$0xff]  ;;  %v637_v10 = vpack.c.bf16 %v95_v7, %v94_v6  ;;  %v114_v14 = vld [vmem:[%s1044_s1 + $0x2e0] sm:$0xff] }
  0x2a   :  { %628 = vmatprep.subr.bf16.mxu0 %v627_v55  ;;  %553 = vmatmul.mubr.msk.f32.vlgmr.msra.gmra.mrb[2].mxu1 %vm127_vm1, %v21_v61  ;;  %v639_v11 = vpack.c.bf16 %v113_v9, %v112_v8  ;;  %v96_v12 = vld [vmem:[%s1044_s1 + $0x250] sm:$0xff]  ;;  %v97_v13 = vld [vmem:[%s1044_s1 + $0x258] sm:$0xff]  ;;  %v115_v15 = vld [vmem:[%s1044_s1 + $0x2e8] sm:$0xff] }
  0x2b   :  { %v641_v16 = vpack.c.bf16 %v97_v13, %v96_v12  ;;  %v643_v17 = vpack.c.bf16 %v115_v15, %v114_v14  ;;  %v98_v18 = vld [vmem:[%s1044_s1 + $0x260] sm:$0xff]  ;;  %v99_v19 = vld [vmem:[%s1044_s1 + $0x268] sm:$0xff]  ;;  %v116_v20 = vld [vmem:[%s1044_s1 + $0x2f0] sm:$0xff] }
  0x2c   :  { %v117_v21 = vld [vmem:[%s1044_s1 + $0x2f8] sm:$0xff]  ;;  %v645_v22 = vpack.c.bf16 %v99_v19, %v98_v18  ;;  %v100_v24 = vld [vmem:[%s1044_s1 + $0x270] sm:$0xff]  ;;  %v19_v27 = vld [vmem:[%s1043_s0 + $0x20] sm:$0xff]  ;;  %s689_s0 = smov [#allocation2]  }
  0x2d   :  { %630 = vmatpush3.bf16.msra.mxu0 %v629_v62  ;;  %v647_v23 = vpack.c.bf16 %v117_v21, %v116_v20  ;;  %v101_v25 = vld [vmem:[%s1044_s1 + $0x278] sm:$0xff]  ;;  %v438_v29 = vld [vmem:[%s1045_s2] ss:$0 sm:$0xff]  ;;  %s430_s1 = sshll.u32 %s689_s0, 4  ;;  %s431_s1 = int_to_ptr.vmem [resolvable:$true] %s430_s1 }
  0x2e   :  { %632 = vmatprep.subr.bf16.mxu0 %v631_v63  ;;  %v649_v26 = vpack.c.bf16 %v101_v25, %v100_v24  ;;  %s662_s2 = scalar_lea.vmem %s431_s1, 128  ;;  %p667_p1 = scmp.lt.s32.totalorder %s431_s1, %s431_s1 }
  0x2f   :  { %p663_p0 = scmp.ne.s32.totalorder %s431_s1, %s662_s2  ;;  %p668_p2 = scmp.lt.s32.totalorder %s662_s2, %s662_s2 }
  0x31   :  { %634 = vmatpush3.bf16.msra.mxu0 %v633_v4  ;;  %p669_p3 = por %p668_p2, %p667_p1 }
  0x32   :  { %636 = vmatprep.subr.bf16.mxu0 %v635_v5 }
  0x33   :  { %p670_p4 = pnand %p669_p3, %p663_p0 }
  0x35   :  { %638 = vmatpush3.bf16.msra.mxu0 %v637_v10 }
  0x36   :  { %640 = vmatprep.subr.bf16.mxu0 %v639_v11 }
  0x39   :  { %642 = vmatpush3.bf16.msra.mxu0 %v641_v16 }
  0x3a   :  { %644 = vmatprep.subr.bf16.mxu0 %v643_v17 }
  0x3d   :  { %646 = vmatpush3.bf16.msra.mxu0 %v645_v22 }
  0x3e   :  { %648 = vmatprep.subr.bf16.mxu0 %v647_v23 }
  0x41   :  { %650 = vmatpush3.bf16.msra.mxu0 %v649_v26 }
  0x44   :  { %336 = vmatmul.mubr.f32.vlgmr.msra.gmra.mrb[2].mxu0 %v19_v27 }
  0xf7   :  { %v472_v28 = vpop.f32.mrb[0].mxu0 }
  0xf8   :  { %v473_v30 = vpop.f32.mrb[1].mxu0 }
  0xf9   :  { %v507_v31 = vpop.f32.mrb[0].mxu1  ;;  %v474_v32 = vadd.f32 %v473_v30, %v472_v28 }
  0xfa   :  { %v508_v33 = vpop.f32.mrb[1].mxu1 }
  0xfb   :  { %v509_v34 = vadd.f32 %v508_v33, %v507_v31  ;;  %v198_v35 = vadd.f32 %v474_v32, %v438_v29 }
  0xfd   :  { %v268_v36 = vadd.f32 %v509_v34, %v198_v35  ;;  %v407_v37 = vpop.f32.mrb[2].mxu1 }
  0xfe   :  { %v554_v38 = vpop.f32.mrb[3].mxu1 }
 0x117   :  { %v542_v39 = vpop.f32.mrb[2].mxu0 }
 0x118   :  { %v543_v40 = vpop.f32.mrb[3].mxu0 }
 0x119   :  { %v544_v41 = vadd.f32 %v543_v40, %v542_v39 }
 0x11b   :  { %v338_v42 = vadd.f32 %v544_v41, %v268_v36 }
 0x11d   :  { %v408_v43 = vadd.f32 %v407_v37, %v338_v42 }
 0x11f   :  { %v412_v44 = vsel %vm411_vm2, %v408_v43, -inf }
 0x120   :  { %413 = vmax.xlane.f32.xlu0 %v412_v44 }
 0x1ad   :  { %v414_v45 = vpop.xlane.xlu0 %413 }
 0x1ae   :  { %v415_v46 = vsub.f32 %v408_v43, %v414_v45 }
 0x1b0   :  { %v416_v47 = vmul.f32 1.442695, %v415_v46 }
 0x1b2   :  { %658 = vpow2.f32 %v416_v47 }
 0x1bc   :  { %v659_v48 = vpop.eup %658 }
 0x1bd   :  { %v418_v49 = vsel %vm411_vm2, %v659_v48, 0.0 }
 0x1be   :  { %419 = vadd.xlane.f32.xlu0 %v418_v49 }
 0x24b   :  { %v420_v50 = vpop.xlane.xlu0 %419 }
 0x24c   :  { %660 = vrcp.f32 %v420_v50 }
 0x256   :  { %v661_v51 = vpop.eup %660 }
 0x257   :  { %v422_v52 = vmul.f32 %v661_v51, %v659_v48 }
 0x259   :  { %423 = vst.msk [vmem:[#allocation2] sm:$0xff] %vm411_vm2, %v422_v52 }
 0x25a   :  { %673 = shalt.err (!%p670_p4)
}
 0x25b   :  { %s674_s10 = scalar_lea.hbm %s1046_s3, 128 }
 0x25c   :  { %p675_p5 = scmp.ne.s32.totalorder %s1046_s3, %s674_s10  ;;  %p678_p6 = scmp.lt.u32.totalorder %s674_s10, %s1046_s3 }
 0x25e   :  { %p680_p7 = pnand %p678_p6, %p675_p5 }
 0x260   :  { %683 = shalt.err (!%p680_p7)
}
 0x261   :  { %433 = dma.vmem_to_hbm [thread:$0]  %s431_s1, 128, %s1046_s3, [#allocation3]  }
 0x262   :  { %684 = dma.done.wait [#allocation3], 128  }
 0x263   :  { %685 = vsyncadd [#allocation3], 4294967168 }
 0x264   :  { %437 = vsyncpa [#allocation3], 1 }

</bundles_post_ra>
